<compile_context>
chip_gen: v7x
topology: tpu7x:2x2x1
jax: 0.10.0
libtpu: 0.0.40
codegen_flags: <defaults>
</compile_context>

<pallas_src>
import functools

import jax
import jax.numpy as jnp
from jax.experimental import pallas as pl
from jax.experimental.pallas import tpu as pltpu


def _round_up(x: int, m: int) -> int:
    return ((x + m - 1) // m) * m


def _texture_complexity_kernel(p_ref, o_ref, *, L: int, eps: float):
    """Per-patch sample-std ("texture complexity").

    p_ref: VMEM ref of shape (1, tm, L)   -- tm patches, L pixels each
    o_ref: VMEM ref of shape (1, tm)      -- lane-dense per-patch result
    """
    x = p_ref[...].astype(jnp.float32)               # (1, tm, L)
    s = jnp.sum(x, axis=-1, keepdims=True)           # (1, tm, 1)
    mean = s * (1.0 / L)                             # full L per valid row
    d = x - mean                                     # (1, tm, L)
    ss = jnp.sum(d * d, axis=-1)                     # (1, tm)  (lane-last)
    inv_denom = 1.0 / (float(L - 1) + eps)           # matches torch: (L-1)+eps
    o_ref[...] = jnp.sqrt(ss * inv_denom).astype(o_ref.dtype)


def texture_complexity(
    patches: jax.Array,
    eps: float = 1e-8,
    *,
    max_rows_per_tile: int = 1024,
    vmem_budget_bytes: int = 16 * 1024 * 1024,
) -> jax.Array:
    """patches: [B, N, L]  ->  complexity: [B, N] (same semantics as the torch module)."""
    B, N, L = patches.shape
    R = B * N
    x = patches.reshape(1, R, L)                     # free, contiguous view

    # --- tile sizing: biggest row-tile that fits the VMEM budget -------------
    in_bytes = jnp.dtype(patches.dtype).itemsize
    L_lanes = _round_up(L, 128)                      # VMEM lane padding
    # 2x double-buffered input block + ~3 full-tile f32 temporaries (upcast,
    # diff, diff^2) created by the two-pass reduction.
    per_row_bytes = L_lanes * (2 * in_bytes + 3 * 4)
    tm_cap = max(128, (vmem_budget_bytes // per_row_bytes) // 128 * 128)
    tm = min(max_rows_per_tile, tm_cap, _round_up(R, 8))
    grid_rows = pl.cdiv(R, tm)

    kernel = functools.partial(_texture_complexity_kernel, L=L, eps=eps)
    out = pl.pallas_call(
        kernel,
        out_shape=jax.ShapeDtypeStruct((grid_rows, tm), patches.dtype),
        grid_spec=pltpu.PrefetchScalarGridSpec(
            num_scalar_prefetch=0,
            grid=(grid_rows,),
            in_specs=[pl.BlockSpec((1, tm, L), lambda i: (0, i, 0))],
            out_specs=pl.BlockSpec((1, tm), lambda i: (i, 0)),
        ),
        compiler_params=pltpu.CompilerParams(
            dimension_semantics=("parallel",),       # v7x: shard tiles over 2 TCs
            vmem_limit_bytes=32 * 1024 * 1024,
        ),
        cost_estimate=pl.CostEstimate(
            flops=3 * R * L,                         # sub + mul + add per pixel
            transcendentals=R,                       # one sqrt per patch
            bytes_accessed=R * L * in_bytes + R * in_bytes,
        ),
    )(x)

    # Drop rows belonging to the (possibly) partial last tile, restore [B, N].
    return out.reshape(grid_rows * tm)[:R].reshape(B, N)


def _reference(patches: jax.Array, eps: float = 1e-8) -> jax.Array:
    """Plain-JAX mirror of the PyTorch forward (for a sanity check)."""
    patch_mean = jnp.mean(patches, axis=-1, keepdims=True)
    L = patches.shape[-1]
    return jnp.sqrt(jnp.sum((patches - patch_mean) ** 2, axis=-1) / (L - 1 + eps))


if __name__ == "__main__":
    key = jax.random.PRNGKey(0)
    k0, k1 = jax.random.split(key)

    # Small shapes consistent with the module: B=2 images, N=8 patches,
    # each patch P=8 -> L = P*P = 64 flattened pixels.
    B, N, P = 2, 8, 8
    L = P * P
    patches = jax.random.normal(k0, (B, N, L), dtype=jnp.float32)

    out = jax.block_until_ready(texture_complexity(patches))
    ref = _reference(patches)
    assert out.shape == (B, N)
    assert jnp.allclose(out, ref, atol=1e-5, rtol=1e-5)

    # Second (still small) shape that exercises a 128-multiple, lane-dense
    # output tile: R = B*N = 384 rows in a single (384, L) tile.
    B2, N2 = 2, 192
    patches2 = jax.random.normal(k1, (B2, N2, L), dtype=jnp.float32)
    out2 = jax.block_until_ready(texture_complexity(patches2))
    ref2 = _reference(patches2)
    assert out2.shape == (B2, N2)
    assert jnp.allclose(out2, ref2, atol=1e-5, rtol=1e-5)

    print("KERNEL_OK")
</pallas_src>

<mosaic_0001>
module attributes {stable_mosaic.version = 11 : i64} {
  func.func @_texture_complexity_kernel(%arg0: i32, %arg1: memref<1x16x64xf32, #tpu.memory_space<vmem>>, %arg2: memref<1x16xf32, #tpu.memory_space<vmem>>) attributes {dimension_semantics = [#tpu.dimension_semantics<parallel>], iteration_bounds = array<i64: 1>, scalar_prefetch = 0 : i64, scratch_operands = 0 : i64, tpu.core_type = #tpu.core_type<tc>, window_params = [{transform_indices = @transform_0, window_bounds = array<i64: 1, 16, 64>}, {transform_indices = @transform_1, window_bounds = array<i64: 1, 16>}]} {
    %c0 = arith.constant 0 : index
    %c0_0 = arith.constant 0 : index
    %c0_1 = arith.constant 0 : index
    %0 = vector.load %arg1[%c0, %c0_0, %c0_1] : memref<1x16x64xf32, #tpu.memory_space<vmem>>, vector<1x16x64xf32>
    %cst = arith.constant dense<0.000000e+00> : vector<1x16xf32>
    %1 = vector.multi_reduction <add>, %0, %cst [2] : vector<1x16x64xf32> to vector<1x16xf32>
    %2 = vector.shape_cast %1 : vector<1x16xf32> to vector<1x16x1xf32>
    %cst_2 = arith.constant 1.562500e-02 : f32
    %3 = vector.broadcast %cst_2 : f32 to vector<1x16x1xf32>
    %4 = arith.mulf %2, %3 : vector<1x16x1xf32>
    %5 = vector.broadcast %4 : vector<1x16x1xf32> to vector<1x16x64xf32>
    %6 = arith.subf %0, %5 : vector<1x16x64xf32>
    %7 = arith.mulf %6, %6 : vector<1x16x64xf32>
    %cst_3 = arith.constant dense<0.000000e+00> : vector<1x16xf32>
    %8 = vector.multi_reduction <add>, %7, %cst_3 [2] : vector<1x16x64xf32> to vector<1x16xf32>
    %cst_4 = arith.constant 0.0158730168 : f32
    %9 = vector.broadcast %cst_4 : f32 to vector<1x16xf32>
    %10 = arith.mulf %8, %9 : vector<1x16xf32>
    %11 = math.sqrt %10 : vector<1x16xf32>
    %c0_5 = arith.constant 0 : index
    %c0_6 = arith.constant 0 : index
    %12 = vector.load %arg2[%c0_5, %c0_6] : memref<1x16xf32, #tpu.memory_space<vmem>>, vector<1x16xf32>
    tpu.vector_store %arg2[%c0_5, %c0_6], %11 {strides = array<i32>} : memref<1x16xf32, #tpu.memory_space<vmem>>, vector<1x16xf32>,
    return
  }
  func.func @transform_0(%arg0: i32) -> (i32, i32, i32) {
    %c0_i32 = arith.constant 0 : i32
    %c0_i32_0 = arith.constant 0 : i32
    %c0_i32_1 = arith.constant 0 : i32
    return %c0_i32, %arg0, %c0_i32_0 : i32, i32, i32
  }
  func.func @transform_1(%arg0: i32) -> (i32, i32) {
    %c0_i32 = arith.constant 0 : i32
    %c0_i32_0 = arith.constant 0 : i32
    return %arg0, %c0_i32 : i32, i32
  }
}

</mosaic_0001>

<bundles_post_ra>
// kernel: tpu_custom_call.1
= control target key start
LH: loop header
LB: loop body
LE: loop exit
PB: predicated region body
PF: predicated region fallthrough
CT: control target
= control target key end

     0   :  { %6 = vsyncpa [#allocation3], 0  ;;  %s191_s0 = inlined_call_operand.hbm [shape: f32[1,16,64], index: 0, kind: input, shape index: {}]   ;;  %s192_s1 = inlined_call_operand.hbm [shape: f32[1,16], index: 1, kind: output, shape index: {}]  }
   0x1   :  { %7 = vsyncpa [#allocation4], 0  ;;  %s149_s6 = smov [#allocation2]   ;;  %s101_s10 = scalar_lea.hbm %s191_s0, 256 }
   0x2   :  { %s13_s7 = sshll.u32 %s149_s6, 4  ;;  %p102_p0 = scmp.ne.s32.totalorder %s191_s0, %s101_s10  ;;  %s14_s7 = int_to_ptr.vmem [resolvable:$true] %s13_s7 }
   0x3   :  { %p105_p1 = scmp.lt.u32.totalorder %s101_s10, %s191_s0 }
   0x5   :  { %p107_p2 = pnand %p105_p1, %p102_p0 }
   0x7   :  { %110 = shalt.err (!%p107_p2)
}
   0x8   :  { %s111_s15 = scalar_lea.vmem %s14_s7, 256  ;;  %p116_p4 = scmp.lt.s32.totalorder %s14_s7, %s14_s7 }
   0x9   :  { %p112_p3 = scmp.ne.s32.totalorder %s14_s7, %s111_s15  ;;  %p117_p5 = scmp.lt.s32.totalorder %s111_s15, %s111_s15 }
   0xb   :  { %p118_p6 = por %p117_p5, %p116_p4 }
   0xd   :  { %p119_p7 = pnand %p118_p6, %p112_p3 }
   0xf   :  { %122 = shalt.err (!%p119_p7)
}
  0x10   :  { %s150_s16 = smov 128   ;;  %s151_s17 = smov 8  }
  0x11   :  { %19 = dma.hbm_to_vmem [thread:$0]  %s191_s0, 256, %s14_s7, [#allocation3], %s150_s16, %s150_s16, %s151_s17  }
  0x12   :  { %145 = dma.done.wait [#allocation3], 256  }
  0x13   :  { %146 = vsyncadd [#allocation3], 4294967040  ;;  %vm25_vm0 = vcmask 523264   ;;  %v23_v0 = vld [vmem:[#allocation2] sm:$0xff]  ;;  %v24_v1 = vld [vmem:[#allocation2 + $0x8] sm:$0xff]  ;;  %v62_v18 = vlaneseq  ;;  %s152_s0 = smov [#allocation5]  }
  0x14   :  { %v26_v2 = vsel %vm25_vm0, %v23_v0, 0.0  ;;  %v29_v3 = vsel %vm25_vm0, %v24_v1, 0.0  ;;  %s84_s20 = sshll.u32 %s152_s0, 4  ;;  %vm73_vm5 = vcmask 130112   ;;  %vm76_vm6 = vcmask 122880   ;;  %s85_s20 = int_to_ptr.vmem [resolvable:$true] %s84_s20 }
  0x15   :  { %27 = vadd.xlane.f32.xlu0 %v26_v2  ;;  %v63_v19 = vand.u32 127, %v62_v18  ;;  %v65_v22 = vshrl.u32 %v62_v18, 7  ;;  %s123_s21 = scalar_lea.vmem %s85_s20, 16  ;;  %s127_s22 = scalar_lea.vmem %s85_s20, 32 }
  0x16   :  { %p124_p8 = scmp.ne.s32.totalorder %s85_s20, %s123_s21  ;;  %p128_p9 = scmp.lt.s32.totalorder %s85_s20, %s85_s20 }
  0x17   :  { %v68_v23 = vadd.s32 4294967288, %v63_v19  ;;  %v66_v28 = vsub.s32 %v63_v19, %v65_v22  ;;  %p129_p10 = scmp.lt.s32.totalorder %s127_s22, %s123_s21 }
  0x19   :  { %30 = vadd.xlane.f32.xlu0 %v29_v3  ;;  %v71_v29 = vsub.s32 %v68_v23, %v65_v22  ;;  %p130_p11 = por %p129_p10, %p128_p9 }
  0x1b   :  { %p131_p12 = pnand %p130_p11, %p124_p8 }
  0xa2   :  { %v28_v4 = vpop.xlane.xlu0 %27 }
  0xa3   :  { %v32_v5 = vmul.f32 0.015625, %v28_v4 }
  0xa5   :  { %v34_v6 = vsub.f32 %v23_v0, %v32_v5 }
  0xa6   :  { %v31_v7 = vpop.xlane.xlu0 %30 }
  0xa7   :  { %v33_v8 = vmul.f32 0.015625, %v31_v7  ;;  %v36_v9 = vmul.f32 %v34_v6, %v34_v6 }
  0xa9   :  { %v35_v10 = vsub.f32 %v24_v1, %v33_v8  ;;  %v38_v11 = vsel %vm25_vm0, %v36_v9, 0.0 }
  0xaa   :  { %39 = vadd.xlane.f32.xlu1 %v38_v11 }
  0xab   :  { %v37_v12 = vmul.f32 %v35_v10, %v35_v10 }
  0xad   :  { %v41_v13 = vsel %vm25_vm0, %v37_v12, 0.0 }
  0xae   :  { %42 = vadd.xlane.f32.xlu1 %v41_v13 }
 0x137   :  { %v40_v14 = vpop.xlane.xlu1 %39 }
 0x138   :  { %v44_v15 = vmul.f32 0.015873017, %v40_v14 }
 0x13a   :  { %97 = vrsqrt.f32 %v44_v15  ;;  %vm48_vm1 = vcmp.eq.f32.partialorder %v44_v15, inf  ;;  %v51_v26 = vand.u32 2147483648, %v44_v15  ;;  %vm50_vm2 = vcmp.eq.f32.partialorder %v44_v15, 0.0 }
 0x13b   :  { %v43_v16 = vpop.xlane.xlu1 %42 }
 0x13c   :  { %v45_v17 = vmul.f32 0.015873017, %v43_v16 }
 0x13e   :  { %99 = vrsqrt.f32 %v45_v17  ;;  %vm55_vm3 = vcmp.eq.f32.partialorder %v45_v17, inf  ;;  %v58_v31 = vand.u32 2147483648, %v45_v17  ;;  %vm57_vm4 = vcmp.eq.f32.partialorder %v45_v17, 0.0 }
 0x144   :  { %v98_v20 = vpop.eup %97 }
 0x145   :  { %v47_v21 = vmul.f32 %v98_v20, %v44_v15 }
 0x147   :  { %v49_v24 = vsel %vm48_vm1, %v44_v15, %v47_v21 }
 0x148   :  { %v100_v25 = vpop.eup %99  ;;  %v52_v30 = vsel %vm50_vm2, %v51_v26, %v49_v24 }
 0x149   :  { %v54_v27 = vmul.f32 %v100_v25, %v45_v17  ;;  %v67_v34 = vrot.slane %v52_v30, %v66_v28 }
 0x14b   :  { %v56_v32 = vsel %vm55_vm3, %v45_v17, %v54_v27 }
 0x14c   :  { %v59_v33 = vsel %vm57_vm4, %v58_v31, %v56_v32 }
 0x14d   :  { %v72_v35 = vrot.slane %v59_v33, %v71_v29 }
 0x14f   :  { %v74_v36 = vsel %vm73_vm5, %v72_v35, %v67_v34 }
 0x150   :  { %77 = vst.msk [vmem:[#allocation5] sm:$0x1] %vm76_vm6, %v74_v36 }
 0x151   :  { %134 = shalt.err (!%p131_p12)
}
 0x152   :  { %s135_s25 = scalar_lea.hbm %s192_s1, 16 }
 0x153   :  { %p136_p13 = scmp.ne.s32.totalorder %s192_s1, %s135_s25  ;;  %p139_p0 = scmp.lt.u32.totalorder %s135_s25, %s192_s1 }
 0x155   :  { %p141_p1 = pnand %p139_p0, %p136_p13 }
 0x157   :  { %144 = shalt.err (!%p141_p1)
}
 0x158   :  { %87 = dma.vmem_to_hbm [thread:$0]  %s85_s20, 16, %s192_s1, [#allocation4]  }
 0x159   :  { %147 = dma.done.wait [#allocation4], 16  }
 0x15a   :  { %148 = vsyncadd [#allocation4], 4294967280 }
 0x15b   :  { %91 = vsyncpa [#allocation3], 1 }
 0x15c   :  { %92 = vsyncpa [#allocation4], 1 }

</bundles_post_ra>
